<compile_context>
chip_gen: v6e
topology: v6e:2x2x1
jax: 0.10.0
libtpu: 0.0.40
codegen_flags: <defaults>
</compile_context>

<pallas_src>
import functools
import math

import jax
import jax.numpy as jnp
from jax.experimental import pallas as pl
from jax.experimental.pallas import tpu as pltpu


_ATTN_KEYS = ("ln_g", "ln_b", "wq", "bq", "wk", "bk", "wv", "bv", "wo", "bo")
_FFN_KEYS = ("ln_g", "ln_b", "w1", "b1", "w2", "b2")


# ----------------------------- in-kernel helpers -----------------------------

def _layernorm(x, gamma, beta, eps=1e-6):
    """torch-style LN (unbiased std, eps added to std), single pass over x."""
    H = x.shape[-1]
    mean = jnp.mean(x, axis=-1, keepdims=True)
    msq = jnp.mean(x * x, axis=-1, keepdims=True)
    var = (msq - mean * mean) * (H / (H - 1.0))          # unbiased correction
    std = jnp.sqrt(jnp.maximum(var, 0.0))
    return gamma * (x - mean) / (std + eps) + beta


def _gelu_tanh(x):
    return 0.5 * x * (1.0 + jnp.tanh(math.sqrt(2.0 / math.pi) * (x + 0.044715 * x * x * x)))


def _attn_sublayer_body(x, addmask, ln_g, ln_b, wq, bq, wk, bk, wv, bv, wo, bo,
                        *, heads, d_k):
    """x + MultiHeadAttention(LayerNorm(x)).

    x: (S, H); addmask: (S, S) additive (0 keep / -1e9 masked)
    wq/wk/wv: (heads, H, d_k); bq/bk/bv: (heads, 1, d_k); wo: (heads, d_k, H); bo: (1, H)
    All matmuls are leading-batch einsums over the head axis (MXU-friendly,
    no lane slicing / concatenation / transposes inside the kernel).
    """
    S, H = x.shape
    xn = _layernorm(x, ln_g, ln_b)
    xb = jnp.broadcast_to(xn[None, :, :], (heads, S, H))

    q = jnp.einsum('hsk,hkd->hsd', xb, wq, preferred_element_type=jnp.float32) + bq
    k = jnp.einsum('hsk,hkd->hsd', xb, wk, preferred_element_type=jnp.float32) + bk
    v = jnp.einsum('hsk,hkd->hsd', xb, wv, preferred_element_type=jnp.float32) + bv

    scale = 1.0 / math.sqrt(d_k)
    s = jnp.einsum('hqd,hkd->hqk', q, k, preferred_element_type=jnp.float32) * scale
    s = s + addmask[None, :, :]                          # additive mask (precomputed)
    s = s - jnp.max(s, axis=-1, keepdims=True)
    p = jnp.exp(s)
    denom = jnp.sum(p, axis=-1, keepdims=True)           # (heads, S, 1)
    ctx = jnp.einsum('hqk,hkd->hqd', p, v, preferred_element_type=jnp.float32)
    ctx = ctx / denom                                    # late normalization (O(h*S*d_k))

    out_h = jnp.einsum('hsd,hdm->hsm', ctx, wo, preferred_element_type=jnp.float32)
    return x + jnp.sum(out_h, axis=0) + bo               # head merge = leading-dim reduce


def _ffn_sublayer_body(x, ln_g, ln_b, w1, b1, w2, b2):
    """x + FFN(LayerNorm(x))."""
    xn = _layernorm(x, ln_g, ln_b)
    h = _gelu_tanh(jnp.dot(xn, w1, preferred_element_type=jnp.float32) + b1)
    return x + jnp.dot(h, w2, preferred_element_type=jnp.float32) + b2


# ----------------------------- Pallas kernels --------------------------------

def r_branch_kernel(r_ref, m_ref, g_ref, b_ref, wq_ref, bq_ref, wk_ref, bk_ref,
                    wv_ref, bv_ref, wo_ref, bo_ref, o_ref, *, heads, d_k):
    """One (branch, batch) attention sublayer; writes into the concatenated output."""
    out = _attn_sublayer_body(
        r_ref[0, 0], m_ref[0, 0],
        g_ref[0], b_ref[0],
        wq_ref[0], bq_ref[0], wk_ref[0], bk_ref[0], wv_ref[0], bv_ref[0],
        wo_ref[0], bo_ref[0],
        heads=heads, d_k=d_k)
    o_ref[0] = out


def attn_ffn_kernel(x_ref, m_ref,
                    ag_ref, ab_ref, wq_ref, bq_ref, wk_ref, bk_ref,
                    wv_ref, bv_ref, wo_ref, bo_ref,
                    fg_ref, fb_ref, w1_ref, b1_ref, w2_ref, b2_ref,
                    o_ref, *, heads, d_k):
    """Fused attention sublayer + FFN sublayer for one batch element."""
    y = _attn_sublayer_body(
        x_ref[0], m_ref[0], ag_ref[...], ab_ref[...],
        wq_ref[...], bq_ref[...], wk_ref[...], bk_ref[...],
        wv_ref[...], bv_ref[...], wo_ref[...], bo_ref[...],
        heads=heads, d_k=d_k)
    y = _ffn_sublayer_body(y, fg_ref[...], fb_ref[...],
                           w1_ref[...], b1_ref[...], w2_ref[...], b2_ref[...])
    o_ref[0] = y


def attn_ffn_blend_kernel(x_ref, m_ref, r_ref,
                          ag_ref, ab_ref, wq_ref, bq_ref, wk_ref, bk_ref,
                          wv_ref, bv_ref, wo_ref, bo_ref,
                          fg_ref, fb_ref, w1_ref, b1_ref, w2_ref, b2_ref,
                          o_ref, *, heads, d_k):
    """Fused attention sublayer + FFN sublayer + final 0.3*r + 0.7*x blend."""
    y = _attn_sublayer_body(
        x_ref[0], m_ref[0], ag_ref[...], ab_ref[...],
        wq_ref[...], bq_ref[...], wk_ref[...], bk_ref[...],
        wv_ref[...], bv_ref[...], wo_ref[...], bo_ref[...],
        heads=heads, d_k=d_k)
    y = _ffn_sublayer_body(y, fg_ref[...], fb_ref[...],
                           w1_ref[...], b1_ref[...], w2_ref[...], b2_ref[...])
    o_ref[0] = 0.3 * r_ref[0] + 0.7 * y


# ----------------------------- wrappers ---------------------------------------

def _prep_attn(p, heads):
    """Pre-split fused (H,H)/(1,H) attention params into per-head layouts (pure JAX)."""
    H = p["wq"].shape[0]
    d_k = H // heads

    def split_w(w):      # (H, H) -> (heads, H, d_k)
        return jnp.transpose(w.reshape(H, heads, d_k), (1, 0, 2))

    def split_b(b):      # (1, H) -> (heads, 1, d_k)
        return b.reshape(heads, d_k)[:, None, :]

    return {
        "ln_g": p["ln_g"], "ln_b": p["ln_b"],
        "wq": split_w(p["wq"]), "bq": split_b(p["bq"]),
        "wk": split_w(p["wk"]), "bk": split_b(p["bk"]),
        "wv": split_w(p["wv"]), "bv": split_b(p["bv"]),
        "wo": p["wo"].reshape(heads, d_k, H), "bo": p["bo"],
    }


def _stack_attn_params(plist):
    return {k: jnp.stack([p[k] for p in plist], axis=0) for k in _ATTN_KEYS}


def r_branch_attention(r_stack, am_stack, pstack, heads):
    """Grid (3, B): all three r-branch attention sublayers in one pallas_call,
    writing directly into the concatenated (B, 3*S_sub, H) buffer."""
    G, B, S_sub, H = r_stack.shape
    d_k = H // heads
    p_args = [pstack[k] for k in _ATTN_KEYS]

    def branch_spec(arr):
        nd = arr.ndim
        return pl.BlockSpec((1,) + arr.shape[1:],
                            lambda g, b: (g,) + (0,) * (nd - 1))

    kernel = functools.partial(r_branch_kernel, heads=heads, d_k=d_k)
    return pl.pallas_call(
        kernel,
        out_shape=jax.ShapeDtypeStruct((B, G * S_sub, H), r_stack.dtype),
        grid=(G, B),
        in_specs=[pl.BlockSpec((1, 1, S_sub, H), lambda g, b: (g, b, 0, 0)),
                  pl.BlockSpec((1, 1, S_sub, S_sub), lambda g, b: (g, b, 0, 0))]
                 + [branch_spec(a) for a in p_args],
        out_specs=pl.BlockSpec((1, S_sub, H), lambda g, b: (b, g, 0)),
        compiler_params=pltpu.CompilerParams(
            dimension_semantics=("parallel", "parallel")),
    )(r_stack, am_stack, *p_args)


def attn_ffn_sublayers(x, addmask, pa, pf, heads, blend_r=None):
    """Grid (B,): fused attention sublayer + FFN sublayer (optionally + blend with r)."""
    B, S, H = x.shape
    d_k = H // heads
    attn_args = [pa[k] for k in _ATTN_KEYS]
    ffn_args = [pf[k] for k in _FFN_KEYS]

    def const_spec(arr):
        nd = arr.ndim
        return pl.BlockSpec(arr.shape, lambda b: (0,) * nd)

    data_args = [x, addmask]
    data_specs = [pl.BlockSpec((1, S, H), lambda b: (b, 0, 0)),
                  pl.BlockSpec((1, S, S), lambda b: (b, 0, 0))]
    if blend_r is None:
        kernel = functools.partial(attn_ffn_kernel, heads=heads, d_k=d_k)
    else:
        kernel = functools.partial(attn_ffn_blend_kernel, heads=heads, d_k=d_k)
        data_args.append(blend_r)
        data_specs.append(pl.BlockSpec((1, S, H), lambda b: (b, 0, 0)))

    return pl.pallas_call(
        kernel,
        out_shape=jax.ShapeDtypeStruct((B, S, H), x.dtype),
        grid=(B,),
        in_specs=data_specs + [const_spec(a) for a in attn_args + ffn_args],
        out_specs=pl.BlockSpec((1, S, H), lambda b: (b, 0, 0)),
        compiler_params=pltpu.CompilerParams(dimension_semantics=("parallel",)),
    )(*data_args, *attn_args, *ffn_args)


def transformer_block_forward(params, x, mask, r1, r2, r3, mask1, mask2, mask3, heads):
    # Additive masks, computed once and reused (0 keep / -1e9 masked).
    addmask = (mask[:, 0] - 1.0) * 1e9        # (B, S, S)
    am1 = (mask1[:, 0] - 1.0) * 1e9
    am2 = (mask2[:, 0] - 1.0) * 1e9
    am3 = (mask3[:, 0] - 1.0) * 1e9

    # Call 1: the three r-branch attention sublayers (stacked), output pre-concatenated.
    pa_r = _stack_attn_params([_prep_attn(params["attn_r1"], heads),
                               _prep_attn(params["attn_r2"], heads),
                               _prep_attn(params["attn_r3"], heads)])
    r_stack = jnp.stack([r1, r2, r3], axis=0)              # (3, B, S_sub, H)
    am_stack = jnp.stack([am1, am2, am3], axis=0)          # (3, B, S_sub, S_sub)
    r = r_branch_attention(r_stack, am_stack, pa_r, heads)  # (B, 3*S_sub, H)

    # Call 2: r path, fused attention + FFN.
    r = attn_ffn_sublayers(r, addmask, _prep_attn(params["attn"], heads),
                           params["ffn"], heads)

    # Call 3: x path, fused attention + FFN + final 0.3*r + 0.7*x blend.
    out = attn_ffn_sublayers(x, addmask, _prep_attn(params["attn1"], heads),
                             params["ffn1"], heads, blend_r=r)
    return out                                              # dropout = identity


# ----------------------------- parameter init ---------------------------------

def _init_attn_params(key, H):
    ks = jax.random.split(key, 8)
    def lin(kw, kb, din, dout):
        return (jax.random.normal(kw, (din, dout), jnp.float32) * 0.02,
                jax.random.normal(kb, (1, dout), jnp.float32) * 0.02)
    wq, bq = lin(ks[0], ks[1], H, H)
    wk, bk = lin(ks[2], ks[3], H, H)
    wv, bv = lin(ks[4], ks[5], H, H)
    wo, bo = lin(ks[6], ks[7], H, H)
    return dict(ln_g=jnp.ones((1, H), jnp.float32), ln_b=jnp.zeros((1, H), jnp.float32),
                wq=wq, bq=bq, wk=wk, bk=bk, wv=wv, bv=bv, wo=wo, bo=bo)


def _init_ffn_params(key, H, Dff):
    ks = jax.random.split(key, 4)
    return dict(ln_g=jnp.ones((1, H), jnp.float32), ln_b=jnp.zeros((1, H), jnp.float32),
                w1=jax.random.normal(ks[0], (H, Dff), jnp.float32) * 0.02,
                b1=jax.random.normal(ks[1], (1, Dff), jnp.float32) * 0.02,
                w2=jax.random.normal(ks[2], (Dff, H), jnp.float32) * 0.02,
                b2=jax.random.normal(ks[3], (1, H), jnp.float32) * 0.02)


# ----------------------------- pure-JAX reference ------------------------------

def _ref_ln(x, g, b, eps=1e-6):
    mean = x.mean(-1, keepdims=True)
    var = ((x - mean) ** 2).sum(-1, keepdims=True) / (x.shape[-1] - 1)
    return g * (x - mean) / (jnp.sqrt(var) + eps) + b


def _ref_attn_sublayer(x, mask, p, heads):
    B, S, H = x.shape
    dk = H // heads
    xn = _ref_ln(x, p["ln_g"][0], p["ln_b"][0])
    def split(t):
        return t.reshape(B, S, heads, dk).transpose(0, 2, 1, 3)
    q = split(xn @ p["wq"] + p["bq"][0])
    k = split(xn @ p["wk"] + p["bk"][0])
    v = split(xn @ p["wv"] + p["bv"][0])
    s = (q @ k.transpose(0, 1, 3, 2)) / math.sqrt(dk)
    s = jnp.where(mask == 0, -1e9, s)
    a = jax.nn.softmax(s, axis=-1)
    ctx = (a @ v).transpose(0, 2, 1, 3).reshape(B, S, H)
    return x + ctx @ p["wo"] + p["bo"][0]


def _ref_ffn_sublayer(x, p):
    xn = _ref_ln(x, p["ln_g"][0], p["ln_b"][0])
    h = _gelu_tanh(xn @ p["w1"] + p["b1"][0])
    return x + h @ p["w2"] + p["b2"][0]


def _ref_forward(params, x, mask, r1, r2, r3, m1, m2, m3, heads):
    r1 = _ref_attn_sublayer(r1, m1, params["attn_r1"], heads)
    r2 = _ref_attn_sublayer(r2, m2, params["attn_r2"], heads)
    r3 = _ref_attn_sublayer(r3, m3, params["attn_r3"], heads)
    r = jnp.concatenate((r1, r2, r3), axis=1)
    r = _ref_attn_sublayer(r, mask, params["attn"], heads)
    r = _ref_ffn_sublayer(r, params["ffn"])
    x = _ref_attn_sublayer(x, mask, params["attn1"], heads)
    x = _ref_ffn_sublayer(x, params["ffn1"])
    return 0.3 * r + 0.7 * x


# ----------------------------- main --------------------------------------------

if __name__ == "__main__":
    B = 2
    S_SUB = 8            # seq length of each of r1, r2, r3
    S = 3 * S_SUB        # seq length of x (must match cat(r1,r2,r3) to share `mask`)
    H = 32               # hidden
    HEADS = 4
    DFF = 4 * H          # feed_forward_hidden

    key = jax.random.PRNGKey(0)
    ks = jax.random.split(key, 16)

    params = {
        "attn_r1": _init_attn_params(ks[0], H),
        "attn_r2": _init_attn_params(ks[1], H),
        "attn_r3": _init_attn_params(ks[2], H),
        "attn":    _init_attn_params(ks[3], H),
        "attn1":   _init_attn_params(ks[4], H),
        "ffn":     _init_ffn_params(ks[5], H, DFF),
        "ffn1":    _init_ffn_params(ks[6], H, DFF),
    }

    x  = jax.random.normal(ks[7],  (B, S, H), jnp.float32)
    r1 = jax.random.normal(ks[8],  (B, S_SUB, H), jnp.float32)
    r2 = jax.random.normal(ks[9],  (B, S_SUB, H), jnp.float32)
    r3 = jax.random.normal(ks[10], (B, S_SUB, H), jnp.float32)

    mask  = (jax.random.uniform(ks[11], (B, 1, S, S)) > 0.2).astype(jnp.float32)
    mask1 = (jax.random.uniform(ks[12], (B, 1, S_SUB, S_SUB)) > 0.2).astype(jnp.float32)
    mask2 = (jax.random.uniform(ks[13], (B, 1, S_SUB, S_SUB)) > 0.2).astype(jnp.float32)
    mask3 = (jax.random.uniform(ks[14], (B, 1, S_SUB, S_SUB)) > 0.2).astype(jnp.float32)
    # avoid fully-masked rows
    mask = mask.at[..., 0].set(1.0)
    mask1 = mask1.at[..., 0].set(1.0)
    mask2 = mask2.at[..., 0].set(1.0)
    mask3 = mask3.at[..., 0].set(1.0)

    out = transformer_block_forward(params, x, mask, r1, r2, r3,
                                    mask1, mask2, mask3, HEADS)
    out = jax.block_until_ready(out)

    ref = _ref_forward(params, x, mask, r1, r2, r3, mask1, mask2, mask3, HEADS)
    ref = jax.block_until_ready(ref)

    assert out.shape == (B, S, H)
    assert jnp.allclose(out, ref, rtol=2e-4, atol=2e-4), \
        f"max abs err = {jnp.max(jnp.abs(out - ref))}"

    print("KERNEL_OK")
</pallas_src>

<mosaic_0001>
module attributes {stable_mosaic.version = 11 : i64} {
  func.func @r_branch_kernel(%arg0: i32, %arg1: i32, %arg2: memref<1x1x8x32xf32, #tpu.memory_space<vmem>>, %arg3: memref<1x1x8x8xf32, #tpu.memory_space<vmem>>, %arg4: memref<1x1x32xf32, #tpu.memory_space<vmem>>, %arg5: memref<1x1x32xf32, #tpu.memory_space<vmem>>, %arg6: memref<1x4x32x8xf32, #tpu.memory_space<vmem>>, %arg7: memref<1x4x1x8xf32, #tpu.memory_space<vmem>>, %arg8: memref<1x4x32x8xf32, #tpu.memory_space<vmem>>, %arg9: memref<1x4x1x8xf32, #tpu.memory_space<vmem>>, %arg10: memref<1x4x32x8xf32, #tpu.memory_space<vmem>>, %arg11: memref<1x4x1x8xf32, #tpu.memory_space<vmem>>, %arg12: memref<1x4x8x32xf32, #tpu.memory_space<vmem>>, %arg13: memref<1x1x32xf32, #tpu.memory_space<vmem>>, %arg14: memref<1x8x32xf32, #tpu.memory_space<vmem>>) attributes {dimension_semantics = [#tpu.dimension_semantics<parallel>, #tpu.dimension_semantics<parallel>], iteration_bounds = array<i64: 3, 2>, scalar_prefetch = 0 : i64, scratch_operands = 0 : i64, tpu.core_type = #tpu.core_type<tc>, window_params = [{transform_indices = @transform_0, window_bounds = array<i64: 1, 1, 8, 32>}, {transform_indices = @transform_1, window_bounds = array<i64: 1, 1, 8, 8>}, {transform_indices = @transform_2, window_bounds = array<i64: 1, 1, 32>}, {transform_indices = @transform_3, window_bounds = array<i64: 1, 1, 32>}, {transform_indices = @transform_4, window_bounds = array<i64: 1, 4, 32, 8>}, {transform_indices = @transform_5, window_bounds = array<i64: 1, 4, 1, 8>}, {transform_indices = @transform_6, window_bounds = array<i64: 1, 4, 32, 8>}, {transform_indices = @transform_7, window_bounds = array<i64: 1, 4, 1, 8>}, {transform_indices = @transform_8, window_bounds = array<i64: 1, 4, 32, 8>}, {transform_indices = @transform_9, window_bounds = array<i64: 1, 4, 1, 8>}, {transform_indices = @transform_10, window_bounds = array<i64: 1, 4, 8, 32>}, {transform_indices = @transform_11, window_bounds = array<i64: 1, 1, 32>}, {transform_indices = @transform_12, window_bounds = array<i64: 1, 8, 32>}]} {
    %c0 = arith.constant 0 : index
    %c0_0 = arith.constant 0 : index
    %c0_1 = arith.constant 0 : index
    %c0_2 = arith.constant 0 : index
    %0 = vector.load %arg2[%c0, %c0_0, %c0_1, %c0_2] : memref<1x1x8x32xf32, #tpu.memory_space<vmem>>, vector<1x1x8x32xf32>
    %1 = vector.shape_cast %0 : vector<1x1x8x32xf32> to vector<8x32xf32>
    %c0_3 = arith.constant 0 : index
    %c0_4 = arith.constant 0 : index
    %c0_5 = arith.constant 0 : index
    %c0_6 = arith.constant 0 : index
    %2 = vector.load %arg3[%c0_3, %c0_4, %c0_5, %c0_6] : memref<1x1x8x8xf32, #tpu.memory_space<vmem>>, vector<1x1x8x8xf32>
    %3 = vector.shape_cast %2 : vector<1x1x8x8xf32> to vector<8x8xf32>
    %c0_7 = arith.constant 0 : index
    %c0_8 = arith.constant 0 : index
    %c0_9 = arith.constant 0 : index
    %4 = vector.load %arg4[%c0_7, %c0_8, %c0_9] : memref<1x1x32xf32, #tpu.memory_space<vmem>>, vector<1x1x32xf32>
    %5 = vector.shape_cast %4 : vector<1x1x32xf32> to vector<1x32xf32>
    %c0_10 = arith.constant 0 : index
    %c0_11 = arith.constant 0 : index
    %c0_12 = arith.constant 0 : index
    %6 = vector.load %arg5[%c0_10, %c0_11, %c0_12] : memref<1x1x32xf32, #tpu.memory_space<vmem>>, vector<1x1x32xf32>
    %7 = vector.shape_cast %6 : vector<1x1x32xf32> to vector<1x32xf32>
    %c0_13 = arith.constant 0 : index
    %c0_14 = arith.constant 0 : index
    %c0_15 = arith.constant 0 : index
    %c0_16 = arith.constant 0 : index
    %8 = vector.load %arg6[%c0_13, %c0_14, %c0_15, %c0_16] : memref<1x4x32x8xf32, #tpu.memory_space<vmem>>, vector<1x4x32x8xf32>
    %9 = vector.shape_cast %8 : vector<1x4x32x8xf32> to vector<4x32x8xf32>
    %c0_17 = arith.constant 0 : index
    %c0_18 = arith.constant 0 : index
    %c0_19 = arith.constant 0 : index
    %c0_20 = arith.constant 0 : index
    %10 = vector.load %arg7[%c0_17, %c0_18, %c0_19, %c0_20] : memref<1x4x1x8xf32, #tpu.memory_space<vmem>>, vector<1x4x1x8xf32>
    %11 = vector.shape_cast %10 : vector<1x4x1x8xf32> to vector<4x1x8xf32>
    %c0_21 = arith.constant 0 : index
    %c0_22 = arith.constant 0 : index
    %c0_23 = arith.constant 0 : index
    %c0_24 = arith.constant 0 : index
    %12 = vector.load %arg8[%c0_21, %c0_22, %c0_23, %c0_24] : memref<1x4x32x8xf32, #tpu.memory_space<vmem>>, vector<1x4x32x8xf32>
    %13 = vector.shape_cast %12 : vector<1x4x32x8xf32> to vector<4x32x8xf32>
    %c0_25 = arith.constant 0 : index
    %c0_26 = arith.constant 0 : index
    %c0_27 = arith.constant 0 : index
    %c0_28 = arith.constant 0 : index
    %14 = vector.load %arg9[%c0_25, %c0_26, %c0_27, %c0_28] : memref<1x4x1x8xf32, #tpu.memory_space<vmem>>, vector<1x4x1x8xf32>
    %15 = vector.shape_cast %14 : vector<1x4x1x8xf32> to vector<4x1x8xf32>
    %c0_29 = arith.constant 0 : index
    %c0_30 = arith.constant 0 : index
    %c0_31 = arith.constant 0 : index
    %c0_32 = arith.constant 0 : index
    %16 = vector.load %arg10[%c0_29, %c0_30, %c0_31, %c0_32] : memref<1x4x32x8xf32, #tpu.memory_space<vmem>>, vector<1x4x32x8xf32>
    %17 = vector.shape_cast %16 : vector<1x4x32x8xf32> to vector<4x32x8xf32>
    %c0_33 = arith.constant 0 : index
    %c0_34 = arith.constant 0 : index
    %c0_35 = arith.constant 0 : index
    %c0_36 = arith.constant 0 : index
    %18 = vector.load %arg11[%c0_33, %c0_34, %c0_35, %c0_36] : memref<1x4x1x8xf32, #tpu.memory_space<vmem>>, vector<1x4x1x8xf32>
    %19 = vector.shape_cast %18 : vector<1x4x1x8xf32> to vector<4x1x8xf32>
    %c0_37 = arith.constant 0 : index
    %c0_38 = arith.constant 0 : index
    %c0_39 = arith.constant 0 : index
    %c0_40 = arith.constant 0 : index
    %20 = vector.load %arg12[%c0_37, %c0_38, %c0_39, %c0_40] : memref<1x4x8x32xf32, #tpu.memory_space<vmem>>, vector<1x4x8x32xf32>
    %21 = vector.shape_cast %20 : vector<1x4x8x32xf32> to vector<4x8x32xf32>
    %c0_41 = arith.constant 0 : index
    %c0_42 = arith.constant 0 : index
    %c0_43 = arith.constant 0 : index
    %22 = vector.load %arg13[%c0_41, %c0_42, %c0_43] : memref<1x1x32xf32, #tpu.memory_space<vmem>>, vector<1x1x32xf32>
    %23 = vector.shape_cast %22 : vector<1x1x32xf32> to vector<1x32xf32>
    %cst = arith.constant dense<0.000000e+00> : vector<8xf32>
    %24 = vector.multi_reduction <add>, %1, %cst [1] : vector<8x32xf32> to vector<8xf32>
    %25 = vector.shape_cast %24 : vector<8xf32> to vector<8x1xf32>
    %cst_44 = arith.constant 3.200000e+01 : f32
    %26 = vector.broadcast %cst_44 : f32 to vector<8x1xf32>
    %27 = arith.divf %25, %26 : vector<8x1xf32>
    %28 = arith.mulf %1, %1 : vector<8x32xf32>
    %cst_45 = arith.constant dense<0.000000e+00> : vector<8xf32>
    %29 = vector.multi_reduction <add>, %28, %cst_45 [1] : vector<8x32xf32> to vector<8xf32>
    %30 = vector.shape_cast %29 : vector<8xf32> to vector<8x1xf32>
    %cst_46 = arith.constant 3.200000e+01 : f32
    %31 = vector.broadcast %cst_46 : f32 to vector<8x1xf32>
    %32 = arith.divf %30, %31 : vector<8x1xf32>
    %33 = arith.mulf %27, %27 : vector<8x1xf32>
    %34 = arith.subf %32, %33 : vector<8x1xf32>
    %cst_47 = arith.constant 1.03225803 : f32
    %35 = vector.broadcast %cst_47 : f32 to vector<8x1xf32>
    %36 = arith.mulf %34, %35 : vector<8x1xf32>
    %cst_48 = arith.constant 0.000000e+00 : f32
    %37 = vector.broadcast %cst_48 : f32 to vector<8x1xf32>
    %38 = arith.maximumf %36, %37 : vector<8x1xf32>
    %39 = math.sqrt %38 : vector<8x1xf32>
    %40 = vector.broadcast %27 : vector<8x1xf32> to vector<8x32xf32>
    %41 = arith.subf %1, %40 : vector<8x32xf32>
    %42 = vector.broadcast %5 : vector<1x32xf32> to vector<8x32xf32>
    %43 = arith.mulf %42, %41 : vector<8x32xf32>
    %cst_49 = arith.constant 9.99999997E-7 : f32
    %44 = vector.broadcast %cst_49 : f32 to vector<8x1xf32>
    %45 = arith.addf %39, %44 : vector<8x1xf32>
    %46 = vector.broadcast %45 : vector<8x1xf32> to vector<8x32xf32>
    %47 = arith.divf %43, %46 : vector<8x32xf32>
    %48 = vector.broadcast %7 : vector<1x32xf32> to vector<8x32xf32>
    %49 = arith.addf %47, %48 : vector<8x32xf32>
    %50 = vector.shape_cast %49 : vector<8x32xf32> to vector<1x8x32xf32>
    %51 = vector.shape_cast %50 : vector<1x8x32xf32> to vector<1x8x32xf32>
    %52 = vector.broadcast %51 : vector<1x8x32xf32> to vector<4x8x32xf32>
    "tpu.trace_start"() <{level = 10 : i32, message = "hsk,hkd->hsd"}> : () -> ()
    %cst_50 = arith.constant dense<0.000000e+00> : vector<4x8x8xf32>
    %53 = tpu.matmul %52, %9, %cst_50 {dimension_numbers = #tpu.dot_dimension_numbers<[2], [1], [1], [2], [0, 0, 0, 1, 1, 2], [0], [0]>} : vector<4x8x32xf32>, vector<4x32x8xf32>, vector<4x8x8xf32> -> vector<4x8x8xf32>
    "tpu.trace_stop"() : () -> ()
    %54 = vector.broadcast %11 : vector<4x1x8xf32> to vector<4x8x8xf32>
    %55 = arith.addf %53, %54 : vector<4x8x8xf32>
    "tpu.trace_start"() <{level = 10 : i32, message = "hsk,hkd->hsd"}> : () -> ()
    %cst_51 = arith.constant dense<0.000000e+00> : vector<4x8x8xf32>
    %56 = tpu.matmul %52, %13, %cst_51 {dimension_numbers = #tpu.dot_dimension_numbers<[2], [1], [1], [2], [0, 0, 0, 1, 1, 2], [0], [0]>} : vector<4x8x32xf32>, vector<4x32x8xf32>, vector<4x8x8xf32> -> vector<4x8x8xf32>
    "tpu.trace_stop"() : () -> ()
    %57 = vector.broadcast %15 : vector<4x1x8xf32> to vector<4x8x8xf32>
    %58 = arith.addf %56, %57 : vector<4x8x8xf32>
    "tpu.trace_start"() <{level = 10 : i32, message = "hsk,hkd->hsd"}> : () -> ()
    %cst_52 = arith.constant dense<0.000000e+00> : vector<4x8x8xf32>
    %59 = tpu.matmul %52, %17, %cst_52 {dimension_numbers = #tpu.dot_dimension_numbers<[2], [1], [1], [2], [0, 0, 0, 1, 1, 2], [0], [0]>} : vector<4x8x32xf32>, vector<4x32x8xf32>, vector<4x8x8xf32> -> vector<4x8x8xf32>
    "tpu.trace_stop"() : () -> ()
    %60 = vector.broadcast %19 : vector<4x1x8xf32> to vector<4x8x8xf32>
    %61 = arith.addf %59, %60 : vector<4x8x8xf32>
    "tpu.trace_start"() <{level = 10 : i32, message = "hqd,hkd->hqk"}> : () -> ()
    %cst_53 = arith.constant dense<0.000000e+00> : vector<4x8x8xf32>
    %62 = tpu.matmul %55, %58, %cst_53 {dimension_numbers = #tpu.dot_dimension_numbers<[2], [2], [1], [1], [0, 0, 0, 1, 1, 1], [0], [0]>} : vector<4x8x8xf32>, vector<4x8x8xf32>, vector<4x8x8xf32> -> vector<4x8x8xf32>
    "tpu.trace_stop"() : () -> ()
    %cst_54 = arith.constant 0.353553385 : f32
    %63 = vector.broadcast %cst_54 : f32 to vector<4x8x8xf32>
    %64 = arith.mulf %62, %63 : vector<4x8x8xf32>
    %65 = vector.shape_cast %3 : vector<8x8xf32> to vector<1x8x8xf32>
    %66 = vector.broadcast %65 : vector<1x8x8xf32> to vector<4x8x8xf32>
    %67 = arith.addf %64, %66 : vector<4x8x8xf32>
    %cst_55 = arith.constant dense<0xFF800000> : vector<4x8xf32>
    %68 = vector.multi_reduction <maximumf>, %67, %cst_55 [2] : vector<4x8x8xf32> to vector<4x8xf32>
    %69 = vector.shape_cast %68 : vector<4x8xf32> to vector<4x8x1xf32>
    %70 = vector.broadcast %69 : vector<4x8x1xf32> to vector<4x8x8xf32>
    %71 = arith.subf %67, %70 : vector<4x8x8xf32>
    %72 = math.exp %71 : vector<4x8x8xf32>
    %cst_56 = arith.constant dense<0.000000e+00> : vector<4x8xf32>
    %73 = vector.multi_reduction <add>, %72, %cst_56 [2] : vector<4x8x8xf32> to vector<4x8xf32>
    %74 = vector.shape_cast %73 : vector<4x8xf32> to vector<4x8x1xf32>
    "tpu.trace_start"() <{level = 10 : i32, message = "hqk,hkd->hqd"}> : () -> ()
    %cst_57 = arith.constant dense<0.000000e+00> : vector<4x8x8xf32>
    %75 = tpu.matmul %72, %61, %cst_57 {dimension_numbers = #tpu.dot_dimension_numbers<[2], [1], [1], [2], [0, 0, 0, 1, 1, 2], [0], [0]>} : vector<4x8x8xf32>, vector<4x8x8xf32>, vector<4x8x8xf32> -> vector<4x8x8xf32>
    "tpu.trace_stop"() : () -> ()
    %76 = vector.broadcast %74 : vector<4x8x1xf32> to vector<4x8x8xf32>
    %77 = arith.divf %75, %76 : vector<4x8x8xf32>
    "tpu.trace_start"() <{level = 10 : i32, message = "hsd,hdm->hsm"}> : () -> ()
    %cst_58 = arith.constant dense<0.000000e+00> : vector<4x8x32xf32>
    %78 = tpu.matmul %77, %21, %cst_58 {dimension_numbers = #tpu.dot_dimension_numbers<[2], [1], [1], [2], [0, 0, 0, 1, 1, 2], [0], [0]>} : vector<4x8x8xf32>, vector<4x8x32xf32>, vector<4x8x32xf32> -> vector<4x8x32xf32>
    "tpu.trace_stop"() : () -> ()
    %cst_59 = arith.constant dense<0.000000e+00> : vector<8x32xf32>
    %79 = vector.multi_reduction <add>, %78, %cst_59 [0] : vector<4x8x32xf32> to vector<8x32xf32>
    %80 = arith.addf %1, %79 : vector<8x32xf32>
    %81 = vector.broadcast %23 : vector<1x32xf32> to vector<8x32xf32>
    %82 = arith.addf %80, %81 : vector<8x32xf32>
    %c0_60 = arith.constant 0 : index
    %c0_61 = arith.constant 0 : index
    %c0_62 = arith.constant 0 : index
    %83 = vector.load %arg14[%c0_60, %c0_61, %c0_62] : memref<1x8x32xf32, #tpu.memory_space<vmem>>, vector<1x8x32xf32>
    %84 = vector.shape_cast %83 : vector<1x8x32xf32> to vector<8x32xf32>
    %85 = vector.shape_cast %82 : vector<8x32xf32> to vector<1x8x32xf32>
    tpu.vector_store %arg14[%c0_60, %c0_61, %c0_62], %85 {strides = array<i32>} : memref<1x8x32xf32, #tpu.memory_space<vmem>>, vector<1x8x32xf32>,
    return
  }
  func.func @transform_0(%arg0: i32, %arg1: i32) -> (i32, i32, i32, i32) {
    %c0_i32 = arith.constant 0 : i32
    %c0_i32_0 = arith.constant 0 : i32
    %c0_i32_1 = arith.constant 0 : i32
    return %arg0, %arg1, %c0_i32, %c0_i32_0 : i32, i32, i32, i32
  }
  func.func @transform_1(%arg0: i32, %arg1: i32) -> (i32, i32, i32, i32) {
    %c0_i32 = arith.constant 0 : i32
    %c0_i32_0 = arith.constant 0 : i32
    %c0_i32_1 = arith.constant 0 : i32
    return %arg0, %arg1, %c0_i32, %c0_i32_0 : i32, i32, i32, i32
  }
  func.func @transform_2(%arg0: i32, %arg1: i32) -> (i32, i32, i32) {
    %c0_i32 = arith.constant 0 : i32
    %c0_i32_0 = arith.constant 0 : i32
    %c0_i32_1 = arith.constant 0 : i32
    return %arg0, %c0_i32, %c0_i32_0 : i32, i32, i32
  }
  func.func @transform_3(%arg0: i32, %arg1: i32) -> (i32, i32, i32) {
    %c0_i32 = arith.constant 0 : i32
    %c0_i32_0 = arith.constant 0 : i32
    %c0_i32_1 = arith.constant 0 : i32
    return %arg0, %c0_i32, %c0_i32_0 : i32, i32, i32
  }
  func.func @transform_4(%arg0: i32, %arg1: i32) -> (i32, i32, i32, i32) {
    %c0_i32 = arith.constant 0 : i32
    %c0_i32_0 = arith.constant 0 : i32
    %c0_i32_1 = arith.constant 0 : i32
    %c0_i32_2 = arith.constant 0 : i32
    return %arg0, %c0_i32, %c0_i32_0, %c0_i32_1 : i32, i32, i32, i32
  }
  func.func @transform_5(%arg0: i32, %arg1: i32) -> (i32, i32, i32, i32) {
    %c0_i32 = arith.constant 0 : i32
    %c0_i32_0 = arith.constant 0 : i32
    %c0_i32_1 = arith.constant 0 : i32
    %c0_i32_2 = arith.constant 0 : i32
    return %arg0, %c0_i32, %c0_i32_0, %c0_i32_1 : i32, i32, i32, i32
  }
  func.func @transform_6(%arg0: i32, %arg1: i32) -> (i32, i32, i32, i32) {
    %c0_i32 = arith.constant 0 : i32
    %c0_i32_0 = arith.constant 0 : i32
    %c0_i32_1 = arith.constant 0 : i32
    %c0_i32_2 = arith.constant 0 : i32
    return %arg0, %c0_i32, %c0_i32_0, %c0_i32_1 : i32, i32, i32, i32
  }
  func.func @transform_7(%arg0: i32, %arg1: i32) -> (i32, i32, i32, i32) {
    %c0_i32 = arith.constant 0 : i32
    %c0_i32_0 = arith.constant 0 : i32
    %c0_i32_1 = arith.constant 0 : i32
    %c0_i32_2 = arith.constant 0 : i32
    return %arg0, %c0_i32, %c0_i32_0, %c0_i32_1 : i32, i32, i32, i32
  }
  func.func @transform_8(%arg0: i32, %arg1: i32) -> (i32, i32, i32, i32) {
    %c0_i32 = arith.constant 0 : i32
    %c0_i32_0 = arith.constant 0 : i32
    %c0_i32_1 = arith.constant 0 : i32
    %c0_i32_2 = arith.constant 0 : i32
    return %arg0, %c0_i32, %c0_i32_0, %c0_i32_1 : i32, i32, i32, i32
  }
  func.func @transform_9(%arg0: i32, %arg1: i32) -> (i32, i32, i32, i32) {
    %c0_i32 = arith.constant 0 : i32
    %c0_i32_0 = arith.constant 0 : i32
    %c0_i32_1 = arith.constant 0 : i32
    %c0_i32_2 = arith.constant 0 : i32
    return %arg0, %c0_i32, %c0_i32_0, %c0_i32_1 : i32, i32, i32, i32
  }
  func.func @transform_10(%arg0: i32, %arg1: i32) -> (i32, i32, i32, i32) {
    %c0_i32 = arith.constant 0 : i32
    %c0_i32_0 = arith.constant 0 : i32
    %c0_i32_1 = arith.constant 0 : i32
    %c0_i32_2 = arith.constant 0 : i32
    return %arg0, %c0_i32, %c0_i32_0, %c0_i32_1 : i32, i32, i32, i32
  }
  func.func @transform_11(%arg0: i32, %arg1: i32) -> (i32, i32, i32) {
    %c0_i32 = arith.constant 0 : i32
    %c0_i32_0 = arith.constant 0 : i32
    %c0_i32_1 = arith.constant 0 : i32
    return %arg0, %c0_i32, %c0_i32_0 : i32, i32, i32
  }
  func.func @transform_12(%arg0: i32, %arg1: i32) -> (i32, i32, i32) {
    %c0_i32 = arith.constant 0 : i32
    %c0_i32_0 = arith.constant 0 : i32
    return %arg1, %arg0, %c0_i32 : i32, i32, i32
  }
}

</mosaic_0001>

<bundles_post_ra>
// kernel: tpu_custom_call.1
= control target key start
LH: loop header
LB: loop body
LE: loop exit
PB: predicated region body
PF: predicated region fallthrough
CT: control target
= control target key end

     0   :  { %s3858_s0 = inlined_call_operand.vmem [shape: f32[3,2,8,32], index: 0, kind: input, shape index: {}]   ;;  %s3859_s1 = inlined_call_operand.vmem [shape: f32[3,2,8,8], index: 1, kind: input, shape index: {}]   ;;  %s3860_s2 = inlined_call_operand.vmem [shape: f32[3,1,32], index: 2, kind: input, shape index: {}]   ;;  %s3861_s3 = inlined_call_operand.vmem [shape: f32[3,1,32], index: 3, kind: input, shape index: {}]   ;;  %s3862_s4 = inlined_call_operand.vmem [shape: f32[3,4,32,8], index: 4, kind: input, shape index: {}]   ;;  %s3863_s5 = inlined_call_operand.vmem [shape: f32[3,4,1,8], index: 5, kind: input, shape index: {}]   ;;  %s3864_s6 = inlined_call_operand.vmem [shape: f32[3,4,32,8], index: 6, kind: input, shape index: {}]   ;;  %s3865_s7 = inlined_call_operand.vmem [shape: f32[3,4,1,8], index: 7, kind: input, shape index: {}]   ;;  %s3866_s8 = inlined_call_operand.vmem [shape: f32[3,4,32,8], index: 8, kind: input, shape index: {}]   ;;  %s3867_s9 = inlined_call_operand.vmem [shape: f32[3,4,1,8], index: 9, kind: input, shape index: {}]   ;;  %s3868_s10 = inlined_call_operand.vmem [shape: f32[3,4,8,32], index: 10, kind: input, shape index: {}]   ;;  %s3869_s11 = inlined_call_operand.vmem [shape: f32[3,1,32], index: 11, kind: input, shape index: {}]   ;;  %s3870_s12 = inlined_call_operand.hbm [shape: f32[2,24,32], index: 12, kind: output, shape index: {}]  }
   0x1   :  { %3876 = sst [smem:[#allocation9_spill]] %s3858_s0 }
   0x2   :  { %3877 = sst [smem:[#allocation10_spill]] %s3859_s1 }
   0x3   :  { %3878 = sst [smem:[#allocation11_spill]] %s3860_s2 }
   0x4   :  { %17 = vsyncpa [#allocation3], 0 }
   0x5   :  { %19 = vsyncpa [#allocation3 + $0x1], 0  ;;  %s3449_s21 = smov 0   ;;  %s3451_s22 = smov 0  }
   0x6   :  { %s3453_s23 = smov 0   ;;  %s3455_s24 = smov 0  }
   0x7   :  { %s3457_s25 = smov 0   ;;  %s3459_s26 = smov 0  }
   0x8   :  { %s3461_s27 = smov 0   ;;  %s3463_s28 = smov 0  }
   0x9 LB: > { %3879 = sst [smem:[#allocation5_spill]] %s3371_s26  ;;  %s2845_s29 = sadd.s32 4294967295, %s3379_s28   ;;  %s3379_s28 = sphi %s3463_s28, %s25_s28   ;;  %s3375_s27 = sphi %s3461_s27, %s3892_s27   ;;  %s3371_s26 = sphi %s3459_s26, %s3891_s26   ;;  %s3367_s25 = sphi %s3457_s25, %s3890_s25   ;;  %s3363_s24 = sphi %s3455_s24, %s3889_s24   ;;  %s3359_s23 = sphi %s3453_s23, %s3895_s23   ;;  %s3355_s22 = sphi %s3451_s22, %s3894_s22   ;;  %s3351_s21 = sphi %s3449_s21, %s3893_s21  }
   0xa   : > { %3880 = sst [smem:[#allocation6_spill]] %s3375_s27  ;;  %s2846_s30 = sadd.s32 4294967294, %s3379_s28  }
   0xb   : > { %s34_s13 = sadd.s32 1, %s3371_s26  ;;  %s37_s14 = sadd.s32 1, %s3375_s27 }
   0xc   : > { %p35_p0 = scmp.ge.s32.totalorder %s34_s13, 2  ;;  %p372_p1 = scmp.ne.s32.totalorder %s3359_s23, %s3355_s22 }
   0xd   : > { %p373_p2 = scmp.eq.s32.totalorder %s2845_s29, 5  ;;  %p378_p5 = scmp.ne.s32.totalorder %s3355_s22, %s3351_s21 }
   0xe   : > { %s3897_s13 = smov (%p35_p0, %s34_s13), 0  ;;  %s3899_s14 = smov (!%p35_p0, %s37_s14), %s3375_s27 }
   0xf   : > { %3881 = sst [smem:[#allocation7_spill]] %s3897_s13  ;;  %s357_s15 = ssub.s32 %s3371_s26, %s3897_s13 }
  0x10   : > { %p3500_p3 = por %p373_p2, %p372_p1  ;;  %p39_p4 = scmp.ge.s32.totalorder %s3899_s14, 3 }
  0x11   : > { %p379_p6 = scmp.eq.s32.totalorder %s2846_s30, 5  ;;  %p2849_p7 = scmp.ge.s32.totalorder %s3379_s28, 1 }
  0x12   : > { %s3901_s14 = smov (%p39_p4, %s3899_s14), 0  ;;  %p490_p9 = scmp.lt.s32.totalorder %s3379_s28, 7 }
  0x13   : > { %3883 = sst [smem:[#allocation8_spill]] %s3901_s14  ;;  %p3509_p8 = por %p379_p6, %p378_p5 }
  0x14   : > { %s358_s18 = ssub.s32 %s3375_s27, %s3901_s14  ;;  %s362_s19 = sadd.s32 1, %s3359_s23 }
  0x15   : > { %s359_s20 = sor.u32 %s358_s18, %s357_s15  ;;  %p491_p10 = pnand %p2849_p7, %p490_p9 }
  0x16   : > { %p360_p11 = scmp.eq.s32.totalorder %s359_s20, 0  ;;  %p584_p12 = scmp.lt.s32.totalorder (!%p491_p10), %s3367_s25, 2 }
  0x17   : > { %494 = sbr.rel (%p491_p10) target bundleno = 1216 (0x4c0), region = 68  ;;  %p586_p13 = scmp.lt.s32.totalorder (!%p491_p10), %s3363_s24, 1 }
  0x18   : > { %s3518_s29 = scalar_select %p360_p11, %s3359_s23, %s362_s19  }
  0x19   : > { %s3885_s0 = sld [smem:[#allocation9_spill]] (!%p491_p10) }
  0x1a   : > { %s3886_s2 = sld [smem:[#allocation11_spill]] (!%p491_p10) }
  0x1b   : > { %s3888_s1 = sld [smem:[#allocation10_spill]] (!%p491_p10) }
  0x1c   : > { %s3523_s30 = scalar_select %p584_p12, %s3367_s25, 2  ;;  %vm710_vm0 = vcmask 261120   ;;  %v3381_v4 = vmov 0.0   ;;  %vm3382_vm1 = vmmov 0   ;;  %vm1665_vm4 = vcmask 64512  }
  0x1d   : > { %s587_s13 = scalar_select %p586_p13, %s3363_s24, 1  ;;  %3001 = vmatprep.subr.mxu0 %v3381_v4  ;;  %3012 = vmatprep.subr.mxu1 %v3381_v4 }
  0x1e   : > { %s2851_s26 = sshll.u32 %s3523_s30, 1  ;;  %3009 = vmatprep.mubr.msk.f32.mxu0 %vm3382_vm1, %v3381_v4  ;;  %3020 = vmatprep.mubr.msk.f32.mxu1 %vm3382_vm1, %v3381_v4 }
  0x1f   : > { %s3527_s14 = sadd.s32 %s2851_s26, %s587_s13  ;;  %s3543_s26 = sshll.u32 %s3523_s30, 7 }
  0x20   : > { %s3875_s15 = sshll.u32 %s3527_s14, 3  ;;  %s3549_s18 = scalar_lea.vmem %s3862_s4, %s3543_s26 }
  0x21   : > { %s591_s20 = scalar_lea.vmem %s3885_s0, %s3875_s15  ;;  %v648_v5 = vld [vmem:[%s3549_s18 + $0x18] sm:$0xff]  ;;  %v647_v7 = vld [vmem:[%s3549_s18 + $0x10] sm:$0xff]  ;;  %v646_v9 = vld [vmem:[%s3549_s18 + $0x8] sm:$0xff]  ;;  %s605_s0 = scalar_lea.vmem %s3861_s3, %s3523_s30 }
  0x22   : > { %v3535_v0 = vld [vmem:[%s591_s20] sm:$0xff]  ;;  %v652_v6 = vld [vmem:[%s3549_s18 + $0x38] sm:$0xff]  ;;  %3002 = vmatpush3.msra.mxu0 %v648_v5  ;;  %v651_v8 = vld [vmem:[%s3549_s18 + $0x30] sm:$0xff]  ;;  %s602_s20 = scalar_lea.vmem %s3886_s2, %s3523_s30  ;;  %s3603_s27 = scalar_lea.vmem %s3864_s6, %s3543_s26 }
  0x23   : > { %v711_v1 = vsel %vm710_vm0, %v3535_v0, 0.0  ;;  %v716_v2 = vmul.f32 %v3535_v0, %v3535_v0  ;;  %3013 = vmatpush3.msra.mxu1 %v652_v6  ;;  %3003 = vmatprep.subr.mxu0 %v3381_v4  ;;  %v650_v10 = vld [vmem:[%s3549_s18 + $0x28] sm:$0xff]  ;;  %v645_v11 = vld [vmem:[%s3549_s18] sm:$0xff]  ;;  %v656_v34 = vld [vmem:[%s3549_s18 + $0x58] sm:$0xff] }
  0x24   : > { %712 = vadd.xlane.f32.xlu0 %v711_v1  ;;  %3014 = vmatprep.subr.mxu1 %v3381_v4  ;;  %v649_v12 = vld [vmem:[%s3549_s18 + $0x20] sm:$0xff]  ;;  %v660_v35 = vld [vmem:[%s3549_s18 + $0x78] sm:$0xff]  ;;  %v655_v36 = vld [vmem:[%s3549_s18 + $0x50] sm:$0xff] }
  0x25   : > { %v717_v3 = vsel %vm710_vm0, %v716_v2, 0.0  ;;  %3004 = vmatpush3.msra.mxu0 %v647_v7  ;;  %3015 = vmatpush3.msra.mxu1 %v651_v8  ;;  %v2866_v28 = vld [vmem:[%s602_s20] ss:$0 sm:$0xff]  ;;  %v659_v37 = vld [vmem:[%s3549_s18 + $0x70] sm:$0xff]  ;;  %v654_v38 = vld [vmem:[%s3549_s18 + $0x48] sm:$0xff]  ;;  %s3657_s20 = scalar_lea.vmem %s3866_s8, %s3543_s26  ;;  %s3725_s26 = sshll.u32 %s3523_s30, 2 }
  0x26   : > { %3005 = vmatprep.subr.mxu0 %v3381_v4  ;;  %3016 = vmatprep.subr.mxu1 %v3381_v4  ;;  %v2867_v31 = vld [vmem:[%s605_s0] ss:$0 sm:$0xff]  ;;  %v658_v39 = vld [vmem:[%s3549_s18 + $0x68] sm:$0xff]  ;;  %v668_v42 = vld [vmem:[%s3603_s27 + $0x18] sm:$0xff]  ;;  %s623_s15 = scalar_lea.vmem %s3865_s7, %s3725_s26  ;;  %s614_s19 = scalar_lea.vmem %s3863_s5, %s3725_s26 }
  0x27   : > { %3006 = vmatpush3.msra.mxu0 %v646_v9  ;;  %3017 = vmatpush3.msra.mxu1 %v650_v10  ;;  %v653_v40 = vld [vmem:[%s3549_s18 + $0x40] sm:$0xff]  ;;  %v672_v43 = vld [vmem:[%s3603_s27 + $0x38] sm:$0xff]  ;;  %v667_v44 = vld [vmem:[%s3603_s27 + $0x10] sm:$0xff]  ;;  %s632_s0 = scalar_lea.vmem %s3867_s9, %s3725_s26  ;;  %s3887_s26 = sshll.u32 %s3527_s14, 3 }
  0x28   : > { %718 = vadd.xlane.f32.xlu0 %v717_v3  ;;  %3007 = vmatprep.subr.mxu0 %v3381_v4  ;;  %v657_v41 = vld [vmem:[%s3549_s18 + $0x60] sm:$0xff]  ;;  %v671_v45 = vld [vmem:[%s3603_s27 + $0x30] sm:$0xff]  ;;  %v666_v46 = vld [vmem:[%s3603_s27 + $0x8] sm:$0xff]  ;;  %s599_s18 = scalar_lea.vmem %s3888_s1, %s3887_s26  ;;  %s2916_s14 = sshll.u32 %s3523_s30, 5 }
  0x29   : > { %3018 = vmatprep.subr.mxu1 %v3381_v4  ;;  %3008 = vmatpush3.msra.mxu0 %v645_v11  ;;  %v670_v47 = vld [vmem:[%s3603_s27 + $0x28] sm:$0xff]  ;;  %v665_v48 = vld [vmem:[%s3603_s27] sm:$0xff]  ;;  %v676_v50 = vld [vmem:[%s3603_s27 + $0x58] sm:$0xff]  ;;  %s637_s13 = scalar_lea.vmem %s3868_s10, %s2916_s14  ;;  %s3193_s26 = smul.u32 3, %s3363_s24 }
  0x2a   : > { %3019 = vmatpush3.msra.mxu1 %v649_v12  ;;  %3023 = vmatprep.subr.mxu0 %v3381_v4  ;;  %v669_v49 = vld [vmem:[%s3603_s27 + $0x20] sm:$0xff]  ;;  %v680_v51 = vld [vmem:[%s3603_s27 + $0x78] sm:$0xff]  ;;  %v675_v52 = vld [vmem:[%s3603_s27 + $0x50] sm:$0xff]  ;;  %s640_s14 = scalar_lea.vmem %s3869_s11, %s3523_s30 }
  0x2b   : > { %3034 = vmatprep.subr.mxu1 %v3381_v4  ;;  %v679_v53 = vld [vmem:[%s3603_s27 + $0x70] sm:$0xff]  ;;  %v674_v54 = vld [vmem:[%s3603_s27 + $0x48] sm:$0xff]  ;;  %v673_v56 = vld [vmem:[%s3603_s27 + $0x40] sm:$0xff] }
  0x2c   : > { %v678_v55 = vld [vmem:[%s3603_s27 + $0x68] sm:$0xff]  ;;  %v677_v57 = vld [vmem:[%s3603_s27 + $0x60] sm:$0xff]  ;;  %v688_v58 = vld [vmem:[%s3657_s20 + $0x18] sm:$0xff] }
  0x2d   : > { %v692_v59 = vld [vmem:[%s3657_s20 + $0x38] sm:$0xff]  ;;  %v687_v60 = vld [vmem:[%s3657_s20 + $0x10] sm:$0xff]  ;;  %v686_v62 = vld [vmem:[%s3657_s20 + $0x8] sm:$0xff] }
  0x2e   : > { %v691_v61 = vld [vmem:[%s3657_s20 + $0x30] sm:$0xff]  ;;  %v690_v63 = vld [vmem:[%s3657_s20 + $0x28] sm:$0xff]  ;;  %v685_v1 = vld [vmem:[%s3657_s20] sm:$0xff] }
  0x2f   : > { %v689_v2 = vld [vmem:[%s3657_s20 + $0x20] sm:$0xff]  ;;  %v696_v3 = vld [vmem:[%s3657_s20 + $0x58] sm:$0xff]  ;;  %v695_v6 = vld [vmem:[%s3657_s20 + $0x50] sm:$0xff] }
  0x30   : > { %v700_v5 = vld [vmem:[%s3657_s20 + $0x78] sm:$0xff]  ;;  %v699_v7 = vld [vmem:[%s3657_s20 + $0x70] sm:$0xff]  ;;  %v694_v8 = vld [vmem:[%s3657_s20 + $0x48] sm:$0xff] }
  0x31   : > { %v698_v9 = vld [vmem:[%s3657_s20 + $0x68] sm:$0xff]  ;;  %v693_v10 = vld [vmem:[%s3657_s20 + $0x40] sm:$0xff] }
  0x32   : > { %v697_v11 = vld [vmem:[%s3657_s20 + $0x60] sm:$0xff] }
  0xad   : > { %v713_v13 = vpop.xlane.xlu0 %712 }
  0xae   : > { %v715_v14 = vmul.f32 0.03125, %v713_v13 }
  0xb0   : > { %v721_v16 = vmul.f32 %v715_v14, %v715_v14  ;;  %v732_v27 = vsub.f32 %v3535_v0, %v715_v14 }
  0xb1   : > { %v719_v15 = vpop.xlane.xlu0 %718 }
  0xb2   : > { %v720_v17 = vmul.f32 0.03125, %v719_v15  ;;  %v739_v29 = vmul.f32 %v2866_v28, %v732_v27 }
  0xb4   : > { %v722_v18 = vsub.f32 %v720_v17, %v721_v16 }
  0xb6   : > { %v723_v19 = vmul.f32 1.032258, %v722_v18 }
  0xb8   : > { %v724_v20 = vmax.f32 %v723_v19, 0.0 }
  0xba   : > { %3267 = vrsqrt.f32 %v724_v20  ;;  %vm727_vm2 = vcmp.eq.f32.partialorder %v724_v20, inf  ;;  %v730_v23 = vand.u32 2147483648, %v724_v20  ;;  %vm729_vm3 = vcmp.eq.f32.partialorder %v724_v20, 0.0 }
  0xc7   : > { %v3268_v21 = vpop.eup %3267 }
  0xc8   : > { %v726_v22 = vmul.f32 %v3268_v21, %v724_v20  ;;  %v2877_v21 = vld [vmem:[%s623_s15 + $0x1] ss:$0 sm:$0xff] }
  0xca   : > { %v728_v24 = vsel %vm727_vm2, %v724_v20, %v726_v22  ;;  %v2876_v20 = vld [vmem:[%s623_s15] ss:$0 sm:$0xff] }
  0xcb   : > { %v731_v25 = vsel %vm729_vm3, %v730_v23, %v728_v24  ;;  %v2868_v24 = vld [vmem:[%s614_s19] ss:$0 sm:$0xff] }
  0xcc   : > { %v740_v26 = vadd.f32 1e-06, %v731_v25  ;;  %v2869_v25 = vld [vmem:[%s614_s19 + $0x1] ss:$0 sm:$0xff] }
  0xce   : > { %3269 = vrcp.f32 %v740_v26 }
  0xdb   : > { %v3270_v30 = vpop.eup %3269 }
  0xdc   : > { %v742_v32 = vmul.f32 %v3270_v30, %v739_v29 }
  0xde   : > { %v3582_v33 = vadd.f32 %v2867_v31, %v742_v32  ;;  %v2878_v32 = vld [vmem:[%s623_s15 + $0x2] ss:$0 sm:$0xff] }
  0xe0   : > { %3010 = vmatmul.mubr.msk.f32.vlgmr.msra.gmra.mxu0 %vm710_vm0, %v3582_v33  ;;  %3021 = vmatmul.mubr.msk.f32.vlgmr.msra.gmra.mxu1 %vm710_vm0, %v3582_v33 }
  0xe1   : > { %3024 = vmatpush3.msra.mxu0 %v656_v34  ;;  %3035 = vmatpush3.msra.mxu1 %v660_v35 }
  0xe2   : > { %3025 = vmatprep.subr.mxu0 %v3381_v4  ;;  %3036 = vmatprep.subr.mxu1 %v3381_v4 }
  0xe3   : > { %3026 = vmatpush3.msra.mxu0 %v655_v36  ;;  %3037 = vmatpush3.msra.mxu1 %v659_v37  ;;  %v2870_v36 = vld [vmem:[%s614_s19 + $0x2] ss:$0 sm:$0xff]  ;;  %v2871_v37 = vld [vmem:[%s614_s19 + $0x3] ss:$0 sm:$0xff]  ;;  %s2634_s19 = sadd.s32 %s3367_s25, %s3193_s26  ;;  %s3383_s25 = smov [#allocation2]  }
  0xe4   : > { %3027 = vmatprep.subr.mxu0 %v3381_v4  ;;  %3038 = vmatprep.subr.mxu1 %v3381_v4  ;;  %s2910_s24 = sshll.u32 %s2634_s19, 7  ;;  %s3291_s26 = sshll.u32 %s3383_s25, 4  ;;  %s3292_s26 = int_to_ptr.vmem [resolvable:$false] %s3291_s26 }
  0xe5   : > { %3028 = vmatpush3.msra.mxu0 %v654_v38  ;;  %3039 = vmatpush3.msra.mxu1 %v658_v39  ;;  %s2636_s27 = scalar_lea.hbm %s3870_s12, %s2910_s24 }
  0xe6   : > { %3029 = vmatprep.subr.mxu0 %v3381_v4  ;;  %3040 = vmatprep.subr.mxu1 %v3381_v4 }
  0xe7   : > { %3030 = vmatpush3.msra.mxu0 %v653_v40  ;;  %3031 = vmatprep.mubr.msk.f32.mxu0 %vm3382_vm1, %v3381_v4 }
  0xe8   : > { %3041 = vmatpush3.msra.mxu1 %v657_v41  ;;  %3042 = vmatprep.mubr.msk.f32.mxu1 %vm3382_vm1, %v3381_v4 }
  0xe9   : > { %3032 = vmatmul.mubr.msk.f32.vlgmr.msra.gmra.mxu0 %vm710_vm0, %v3582_v33  ;;  %3043 = vmatmul.mubr.msk.f32.vlgmr.msra.gmra.mxu1 %vm710_vm0, %v3582_v33 }
  0xea   : > { %3045 = vmatprep.subr.mxu0 %v3381_v4  ;;  %3056 = vmatprep.subr.mxu1 %v3381_v4 }
  0xeb   : > { %3046 = vmatpush3.msra.mxu0 %v668_v42  ;;  %3057 = vmatpush3.msra.mxu1 %v672_v43 }
  0xec   : > { %3047 = vmatprep.subr.mxu0 %v3381_v4  ;;  %3058 = vmatprep.subr.mxu1 %v3381_v4 }
  0xed   : > { %3048 = vmatpush3.msra.mxu0 %v667_v44  ;;  %3059 = vmatpush3.msra.mxu1 %v671_v45  ;;  %v2884_v44 = vld [vmem:[%s632_s0] ss:$0 sm:$0xff]  ;;  %v2885_v45 = vld [vmem:[%s632_s0 + $0x1] ss:$0 sm:$0xff] }
  0xee   : > { %3049 = vmatprep.subr.mxu0 %v3381_v4  ;;  %3060 = vmatprep.subr.mxu1 %v3381_v4 }
  0xef   : > { %3050 = vmatpush3.msra.mxu0 %v666_v46  ;;  %3061 = vmatpush3.msra.mxu1 %v670_v47 }
  0xf0   : > { %3051 = vmatprep.subr.mxu0 %v3381_v4  ;;  %3062 = vmatprep.subr.mxu1 %v3381_v4 }
  0xf1   : > { %3052 = vmatpush3.msra.mxu0 %v665_v48  ;;  %3053 = vmatprep.mubr.msk.f32.mxu0 %vm3382_vm1, %v3381_v4 }
  0xf2   : > { %3063 = vmatpush3.msra.mxu1 %v669_v49  ;;  %3064 = vmatprep.mubr.msk.f32.mxu1 %vm3382_vm1, %v3381_v4 }
  0xf3   : > { %3054 = vmatmul.mubr.msk.f32.vlgmr.msra.gmra.mxu0 %vm710_vm0, %v3582_v33  ;;  %3065 = vmatmul.mubr.msk.f32.vlgmr.msra.gmra.mxu1 %vm710_vm0, %v3582_v33 }
  0xf4   : > { %3067 = vmatprep.subr.mxu0 %v3381_v4  ;;  %3078 = vmatprep.subr.mxu1 %v3381_v4 }
  0xf5   : > { %3068 = vmatpush3.msra.mxu0 %v676_v50  ;;  %3079 = vmatpush3.msra.mxu1 %v680_v51 }
  0xf6   : > { %3069 = vmatprep.subr.mxu0 %v3381_v4  ;;  %3080 = vmatprep.subr.mxu1 %v3381_v4 }
  0xf7   : > { %3070 = vmatpush3.msra.mxu0 %v675_v52  ;;  %3081 = vmatpush3.msra.mxu1 %v679_v53  ;;  %v2886_v52 = vld [vmem:[%s632_s0 + $0x2] ss:$0 sm:$0xff]  ;;  %v2887_v53 = vld [vmem:[%s632_s0 + $0x3] ss:$0 sm:$0xff]  ;;  %s581_s0 = sand.u32 1, %s3355_s22  }
  0xf8   : > { %3071 = vmatprep.subr.mxu0 %v3381_v4  ;;  %3082 = vmatprep.subr.mxu1 %v3381_v4  ;;  %s2623_s30 = scalar_lea.sflag [#allocation3], %s581_s0 }
  0xf9   : > { %3072 = vmatpush3.msra.mxu0 %v674_v54  ;;  %3083 = vmatpush3.msra.mxu1 %v678_v55 }
  0xfa   : > { %3073 = vmatprep.subr.mxu0 %v3381_v4  ;;  %3084 = vmatprep.subr.mxu1 %v3381_v4 }
  0xfb   : > { %3074 = vmatpush3.msra.mxu0 %v673_v56  ;;  %3075 = vmatprep.mubr.msk.f32.mxu0 %vm3382_vm1, %v3381_v4 }
  0xfc   : > { %3085 = vmatpush3.msra.mxu1 %v677_v57  ;;  %3086 = vmatprep.mubr.msk.f32.mxu1 %vm3382_vm1, %v3381_v4 }
  0xfd   : > { %3076 = vmatmul.mubr.msk.f32.vlgmr.msra.gmra.mxu0 %vm710_vm0, %v3582_v33  ;;  %3087 = vmatmul.mubr.msk.f32.vlgmr.msra.gmra.mxu1 %vm710_vm0, %v3582_v33 }
  0xfe   : > { %3089 = vmatprep.subr.mxu0 %v3381_v4  ;;  %3100 = vmatprep.subr.mxu1 %v3381_v4 }
  0xff   : > { %3090 = vmatpush3.msra.mxu0 %v688_v58  ;;  %3101 = vmatpush3.msra.mxu1 %v692_v59 }
 0x100   : > { %3091 = vmatprep.subr.mxu0 %v3381_v4  ;;  %3102 = vmatprep.subr.mxu1 %v3381_v4 }
 0x101   : > { %3092 = vmatpush3.msra.mxu0 %v687_v60  ;;  %3103 = vmatpush3.msra.mxu1 %v691_v61 }
 0x102   : > { %3093 = vmatprep.subr.mxu0 %v3381_v4  ;;  %3104 = vmatprep.subr.mxu1 %v3381_v4 }
 0x103   : > { %3094 = vmatpush3.msra.mxu0 %v686_v62  ;;  %3105 = vmatpush3.msra.mxu1 %v690_v63  ;;  %v642_v62 = vld [vmem:[%s599_s18] sm:$0xff] }
 0x104   : > { %3095 = vmatprep.subr.mxu0 %v3381_v4  ;;  %3106 = vmatprep.subr.mxu1 %v3381_v4 }
 0x105   : > { %3096 = vmatpush3.msra.mxu0 %v685_v1  ;;  %3097 = vmatprep.mubr.msk.f32.mxu0 %vm3382_vm1, %v3381_v4 }
 0x106   : > { %3107 = vmatpush3.msra.mxu1 %v689_v2  ;;  %3108 = vmatprep.mubr.msk.f32.mxu1 %vm3382_vm1, %v3381_v4 }
 0x107   : > { %3098 = vmatmul.mubr.msk.f32.vlgmr.msra.gmra.mxu0 %vm710_vm0, %v3582_v33  ;;  %3109 = vmatmul.mubr.msk.f32.vlgmr.msra.gmra.mxu1 %vm710_vm0, %v3582_v33 }
 0x108   : > { %3111 = vmatprep.subr.mxu0 %v3381_v4  ;;  %3122 = vmatprep.subr.mxu1 %v3381_v4 }
 0x109   : > { %3112 = vmatpush3.msra.mxu0 %v696_v3  ;;  %3123 = vmatpush3.msra.mxu1 %v700_v5 }
 0x10a   : > { %3113 = vmatprep.subr.mxu0 %v3381_v4  ;;  %3124 = vmatprep.subr.mxu1 %v3381_v4 }
 0x10b   : > { %3114 = vmatpush3.msra.mxu0 %v695_v6  ;;  %3125 = vmatpush3.msra.mxu1 %v699_v7 }
 0x10c   : > { %3115 = vmatprep.subr.mxu0 %v3381_v4  ;;  %3126 = vmatprep.subr.mxu1 %v3381_v4 }
 0x10d   : > { %3116 = vmatpush3.msra.mxu0 %v694_v8  ;;  %3127 = vmatpush3.msra.mxu1 %v698_v9 }
 0x10e   : > { %3117 = vmatprep.subr.mxu0 %v3381_v4  ;;  %3128 = vmatprep.subr.mxu1 %v3381_v4 }
 0x10f   : > { %3118 = vmatpush3.msra.mxu0 %v693_v10  ;;  %3119 = vmatprep.mubr.msk.f32.mxu0 %vm3382_vm1, %v3381_v4 }
 0x110   : > { %3129 = vmatpush3.msra.mxu1 %v697_v11  ;;  %3130 = vmatprep.mubr.msk.f32.mxu1 %vm3382_vm1, %v3381_v4 }
 0x111   : > { %3120 = vmatmul.mubr.msk.f32.vlgmr.msra.gmra.mxu0 %vm710_vm0, %v3582_v33  ;;  %3131 = vmatmul.mubr.msk.f32.vlgmr.msra.gmra.mxu1 %vm710_vm0, %v3582_v33  ;;  %v2879_v33 = vld [vmem:[%s623_s15 + $0x3] ss:$0 sm:$0xff]  ;;  %s2850_s15 = sshll.u32 %s581_s0, 3 }
 0x112   : > { %3133 = vmatprep.subr.mxu0 %v3381_v4  ;;  %3138 = vmatprep.subr.mxu1 %v3381_v4  ;;  %s583_s20 = scalar_lea.vmem [#allocation2], %s2850_s15  ;;  %s3293_s15 = scalar_lea.vmem %s3292_s26, 256 }
 0x113   : > { %3135 = vmatprep.mubr.msk.f32.mxu0 %vm3382_vm1, %v3381_v4  ;;  %3140 = vmatprep.mubr.msk.f32.mxu1 %vm3382_vm1, %v3381_v4 }
 0x1a0   : > { %v843_v12 = vpop.f32.mrf.mxu0  ;;  %v913_v13 = vpop.f32.mrf.mxu1 }
 0x1a1   : > { %v844_v30 = vadd.f32 %v2868_v24, %v843_v12  ;;  %v914_v31 = vadd.f32 %v2869_v25, %v913_v13 }
 0x1a2   : > { %v3011_v14 = vpop.f32.mrf.mxu0  ;;  %v3022_v15 = vpop.f32.mrf.mxu1 }
 0x1a9   : > { %v983_v16 = vpop.f32.mrf.mxu0  ;;  %v1053_v17 = vpop.f32.mrf.mxu1 }
 0x1aa   : > { %v984_v42 = vadd.f32 %v2870_v36, %v983_v16  ;;  %v1054_v43 = vadd.f32 %v2871_v37, %v1053_v17 }
 0x1ab   : > { %v3033_v18 = vpop.f32.mrf.mxu0  ;;  %v3044_v19 = vpop.f32.mrf.mxu1 }
 0x1b3   : > { %v1147_v22 = vpop.f32.mrf.mxu0  ;;  %v1217_v23 = vpop.f32.mrf.mxu1 }
 0x1b4   : > { %v1148_v26 = vadd.f32 %v2876_v20, %v1147_v22  ;;  %v1218_v27 = vadd.f32 %v2877_v21, %v1217_v23 }
 0x1b5   : > { %v3055_v28 = vpop.f32.mrf.mxu0  ;;  %v3066_v29 = vpop.f32.mrf.mxu1 }
 0x1b6   : > { %3134 = vmatpush3.xpose.msk.msra.mxu0 %vm1665_vm4, %v1148_v26  ;;  %3139 = vmatpush3.xpose.msk.msra.mxu1 %vm1665_vm4, %v1218_v27 }
 0x1b7   : > { %3143 = vmatprep.subr.mxu0 %v3381_v4  ;;  %3148 = vmatprep.subr.mxu1 %v3381_v4 }
 0x1b9   : > { %3136 = vmatmul.mubr.msk.f32.vlgmr.msra.gmra.mxu0 %vm1665_vm4, %v844_v30  ;;  %3141 = vmatmul.mubr.msk.f32.vlgmr.msra.gmra.mxu1 %vm1665_vm4, %v914_v31 }
 0x1ba   : > { %3145 = vmatprep.mubr.msk.f32.mxu0 %vm3382_vm1, %v3381_v4  ;;  %3150 = vmatprep.mubr.msk.f32.mxu1 %vm3382_vm1, %v3381_v4 }
 0x1bd   : > { %v1287_v34 = vpop.f32.mrf.mxu0  ;;  %v1357_v35 = vpop.f32.mrf.mxu1 }
 0x1be   : > { %v1288_v38 = vadd.f32 %v2878_v32, %v1287_v34  ;;  %v1358_v39 = vadd.f32 %v2879_v33, %v1357_v35 }
 0x1bf   : > { %v3077_v40 = vpop.f32.mrf.mxu0  ;;  %v3088_v41 = vpop.f32.mrf.mxu1 }
 0x1c0   : > { %3144 = vmatpush3.xpose.msk.msra.mxu0 %vm1665_vm4, %v1288_v38  ;;  %3149 = vmatpush3.xpose.msk.msra.mxu1 %vm1665_vm4, %v1358_v39  ;;  %v705_v39 = vld [vmem:[%s637_s13] sm:$0xff]  ;;  %v706_v40 = vld [vmem:[%s637_s13 + $0x8] sm:$0xff] }
 0x1c1   : > { %3153 = vmatprep.subr.mxu0 %v3381_v4  ;;  %3158 = vmatprep.subr.mxu1 %v3381_v4 }
 0x1c3   : > { %3146 = vmatmul.mubr.msk.f32.vlgmr.msra.gmra.mxu0 %vm1665_vm4, %v984_v42  ;;  %3151 = vmatmul.mubr.msk.f32.vlgmr.msra.gmra.mxu1 %vm1665_vm4, %v1054_v43 }
 0x1c4   : > { %3155 = vmatprep.mubr.msk.f32.mxu0 %vm3382_vm1, %v3381_v4  ;;  %3160 = vmatprep.mubr.msk.f32.mxu1 %vm3382_vm1, %v3381_v4 }
 0x1c7   : > { %v1451_v46 = vpop.f32.mrf.mxu0  ;;  %v1521_v47 = vpop.f32.mrf.mxu1 }
 0x1c8   : > { %v1452_v48 = vadd.f32 %v2884_v44, %v1451_v46  ;;  %v1522_v49 = vadd.f32 %v2885_v45, %v1521_v47 }
 0x1c9   : > { %v3099_v50 = vpop.f32.mrf.mxu0  ;;  %v3110_v51 = vpop.f32.mrf.mxu1 }
 0x1ca   : > { %3154 = vmatpush3.msra.mxu0 %v1452_v48  ;;  %3159 = vmatpush3.msra.mxu1 %v1522_v49  ;;  %v707_v48 = vld [vmem:[%s637_s13 + $0x10] sm:$0xff] }
 0x1cb   : > { %3163 = vmatprep.subr.mxu0 %v3381_v4  ;;  %3168 = vmatprep.subr.mxu1 %v3381_v4 }
 0x1d1   : > { %v1591_v54 = vpop.f32.mrf.mxu0  ;;  %v1661_v55 = vpop.f32.mrf.mxu1 }
 0x1d2   : > { %v1592_v56 = vadd.f32 %v2886_v52, %v1591_v54  ;;  %v1662_v57 = vadd.f32 %v2887_v53, %v1661_v55  ;;  %v708_v53 = vld [vmem:[%s637_s13 + $0x18] sm:$0xff]  ;;  %s2638_s13 = sshll.u32 %s583_s20, 4  ;;  %s2639_s13 = int_to_ptr.vmem [resolvable:$true] %s2638_s13 }
 0x1d3   : > { %v3121_v58 = vpop.f32.mrf.mxu0  ;;  %v3132_v59 = vpop.f32.mrf.mxu1  ;;  %s3287_s18 = scalar_lea.vmem %s2639_s13, 128  ;;  %p3294_p4 = scmp.lt.s32.totalorder %s2639_s13, %s3292_s26 }
 0x1d4   : > { %p3288_p0 = scmp.ne.s32.totalorder %s2639_s13, %s3287_s18  ;;  %p3295_p5 = scmp.lt.s32.totalorder %s3293_s15, %s3287_s18 }
 0x1d6   : > { %p3289_p1 = pnand %p3288_p0, %p3500_p3  ;;  %p3296_p6 = por %p3295_p5, %p3294_p4 }
 0x1d8   : > { %p3290_p2 = pneg %p3289_p1 }
 0x1da   : > { %p3297_p7 = pnand %p3296_p6, %p3290_p2 }
 0x279   : > { %v1738_v60 = vpop.f32.mrf.mxu0  ;;  %v1814_v61 = vpop.f32.mrf.mxu1 }
 0x27a   : > { %v1970_v63 = vmul.f32 0.35355338, %v1738_v60  ;;  %v1971_v1 = vmul.f32 0.35355338, %v1814_v61 }
 0x27b   : > { %v3137_v2 = vpop.f32.mrf.mxu0  ;;  %v3142_v3 = vpop.f32.mrf.mxu1 }
 0x27c   : > { %v1974_v5 = vadd.f32 %v1970_v63, %v642_v62  ;;  %v1975_v7 = vadd.f32 %v1971_v1, %v642_v62 }
 0x27e   : > { %v1978_v6 = vsel %vm1665_vm4, %v1974_v5, -inf  ;;  %v1981_v8 = vsel %vm1665_vm4, %v1975_v7, -inf }
 0x27f   : > { %1979 = vmax.xlane.f32.xlu1 %v1978_v6 }
 0x283   : > { %v1890_v9 = vpop.f32.mrf.mxu0  ;;  %v1966_v10 = vpop.f32.mrf.mxu1  ;;  %1982 = vmax.xlane.f32.xlu1 %v1981_v8 }
 0x284   : > { %v1972_v11 = vmul.f32 0.35355338, %v1890_v9  ;;  %v1973_v12 = vmul.f32 0.35355338, %v1966_v10 }
 0x285   : > { %v3152_v13 = vpop.f32.mrf.mxu1  ;;  %v3147_v14 = vpop.f32.mrf.mxu0 }
 0x286   : > { %v1977_v15 = vadd.f32 %v1973_v12, %v642_v62  ;;  %v1976_v16 = vadd.f32 %v1972_v11, %v642_v62 }
 0x288   : > { %v1987_v17 = vsel %vm1665_vm4, %v1977_v15, -inf  ;;  %v1984_v18 = vsel %vm1665_vm4, %v1976_v16, -inf }
 0x289   : > { %1988 = vmax.xlane.f32.xlu1 %v1987_v17  ;;  %1985 = vmax.xlane.f32.xlu0 %v1984_v18 }
 0x308   : > { %v1980_v19 = vpop.xlane.xlu1 %1979 }
 0x309   : > { %v1990_v20 = vsub.f32 %v1974_v5, %v1980_v19 }
 0x30b   : > { %v1994_v21 = vmul.f32 1.442695, %v1990_v20 }
 0x30c   : > { %v1983_v22 = vpop.xlane.xlu1 %1982 }
 0x30d   : > { %3271 = vpow2.f32 %v1994_v21  ;;  %v1991_v23 = vsub.f32 %v1975_v7, %v1983_v22 }
 0x30f   : > { %v1996_v24 = vmul.f32 1.442695, %v1991_v23 }
 0x311   : > { %3273 = vpow2.f32 %v1996_v24 }
 0x312   : > { %v1989_v25 = vpop.xlane.xlu1 %1988  ;;  %v1986_v26 = vpop.xlane.xlu0 %1985 }
 0x313   : > { %v1993_v27 = vsub.f32 %v1977_v15, %v1989_v25  ;;  %v1992_v28 = vsub.f32 %v1976_v16, %v1986_v26  ;;  %v2908_v15 = vld [vmem:[%s640_s14] ss:$0 sm:$0xff] }
 0x315   : > { %v2000_v29 = vmul.f32 1.442695, %v1993_v27  ;;  %v1998_v30 = vmul.f32 1.442695, %v1992_v28 }
 0x317   : > { %3275 = vpow2.f32 %v2000_v29 }
 0x318   : > { %3277 = vpow2.f32 %v1998_v30 }
 0x31a   : > { %v3272_v31 = vpop.eup %3271 }
 0x31b   : > { %3156 = vmatmul.mubr.msk.f32.vlgmr.msra.gmra.mxu0 %vm1665_vm4, %v3272_v31  ;;  %v2002_v32 = vsel %vm1665_vm4, %v3272_v31, 0.0 }
 0x31c   : > { %3164 = vmatpush3.msra.mxu0 %v1592_v56  ;;  %2003 = vadd.xlane.f32.xlu0 %v2002_v32 }
 0x31d   : > { %3165 = vmatprep.mubr.msk.f32.mxu0 %vm3382_vm1, %v3381_v4  ;;  %3173 = vmatprep.subr.mxu0 %v3381_v4 }
 0x31e   : > { %v3274_v33 = vpop.eup %3273 }
 0x31f   : > { %3161 = vmatmul.mubr.msk.f32.vlgmr.msra.gmra.mxu1 %vm1665_vm4, %v3274_v33  ;;  %v2005_v34 = vsel %vm1665_vm4, %v3274_v33, 0.0 }
 0x320   : > { %3169 = vmatpush3.msra.mxu1 %v1662_v57  ;;  %2006 = vadd.xlane.f32.xlu1 %v2005_v34 }
 0x321   : > { %3170 = vmatprep.mubr.msk.f32.mxu1 %vm3382_vm1, %v3381_v4  ;;  %3178 = vmatprep.subr.mxu1 %v3381_v4 }
 0x324   : > { %v3276_v35 = vpop.eup %3275 }
 0x325   : > { %v3278_v36 = vpop.eup %3277  ;;  %3171 = vmatmul.mubr.msk.f32.vlgmr.msra.gmra.mxu1 %vm1665_vm4, %v3276_v35  ;;  %v2011_v37 = vsel %vm1665_vm4, %v3276_v35, 0.0 }
 0x326   : > { %3166 = vmatmul.mubr.msk.f32.vlgmr.msra.gmra.mxu0 %vm1665_vm4, %v3278_v36  ;;  %2012 = vadd.xlane.f32.xlu1 %v2011_v37  ;;  %v2008_v38 = vsel %vm1665_vm4, %v3278_v36, 0.0 }
 0x327   : > { %2009 = vadd.xlane.f32.xlu0 %v2008_v38  ;;  %3175 = vmatprep.mubr.msk.f32.mxu0 %vm3382_vm1, %v3381_v4 }
 0x328   : > { %3180 = vmatprep.mubr.msk.f32.mxu1 %vm3382_vm1, %v3381_v4  ;;  %3174 = vmatpush3.msra.mxu0 %v705_v39 }
 0x329   : > { %3183 = vmatprep.subr.mxu0 %v3381_v4  ;;  %3179 = vmatpush3.msra.mxu1 %v706_v40 }
 0x32a   : > { %3188 = vmatprep.subr.mxu1 %v3381_v4 }
 0x3a5   : > { %v2004_v41 = vpop.xlane.xlu0 %2003 }
 0x3a6   : > { %3279 = vrcp.f32 %v2004_v41 }
 0x3a9   : > { %v2007_v42 = vpop.xlane.xlu1 %2006 }
 0x3aa   : > { %3281 = vrcp.f32 %v2007_v42 }
 0x3af   : > { %v2013_v43 = vpop.xlane.xlu1 %2012 }
 0x3b0   : > { %v2010_v44 = vpop.xlane.xlu0 %2009  ;;  %3283 = vrcp.f32 %v2013_v43 }
 0x3b1   : > { %3285 = vrcp.f32 %v2010_v44 }
 0x3b3   : > { %v3280_v45 = vpop.eup %3279 }
 0x3b7   : > { %v3282_v50 = vpop.eup %3281 }
 0x3bd   : > { %v3284_v55 = vpop.eup %3283 }
 0x3be   : > { %v3286_v57 = vpop.eup %3285 }
 0x3db   : > { %v2083_v46 = vpop.f32.mrf.mxu0 }
 0x3dc   : > { %v2307_v47 = vmul.f32 %v3280_v45, %v2083_v46 }
 0x3dd   : > { %v3157_v49 = vpop.f32.mrf.mxu0 }
 0x3de   : > { %3176 = vmatmul.mubr.msk.f32.vlgmr.msra.gmra.mxu0 %vm1665_vm4, %v2307_v47 }
 0x3df   : > { %v2156_v51 = vpop.f32.mrf.mxu1  ;;  %3184 = vmatpush3.msra.mxu0 %v707_v48  ;;  %3185 = vmatprep.mubr.msk.f32.mxu0 %vm3382_vm1, %v3381_v4 }
 0x3e0   : > { %v2309_v52 = vmul.f32 %v3282_v50, %v2156_v51 }
 0x3e1   : > { %v3162_v54 = vpop.f32.mrf.mxu1 }
 0x3e2   : > { %3181 = vmatmul.mubr.msk.f32.vlgmr.msra.gmra.mxu1 %vm1665_vm4, %v2309_v52 }
 0x3e3   : > { %3189 = vmatpush3.msra.mxu1 %v708_v53  ;;  %3190 = vmatprep.mubr.msk.f32.mxu1 %vm3382_vm1, %v3381_v4 }
 0x3e5   : > { %v2302_v56 = vpop.f32.mrf.mxu1 }
 0x3e6   : > { %v2229_v58 = vpop.f32.mrf.mxu0  ;;  %v2313_v59 = vmul.f32 %v3284_v55, %v2302_v56 }
 0x3e7   : > { %v2311_v60 = vmul.f32 %v3286_v57, %v2229_v58  ;;  %v3172_v61 = vpop.f32.mrf.mxu1 }
 0x3e8   : > { %v3167_v62 = vpop.f32.mrf.mxu0  ;;  %3191 = vmatmul.mubr.msk.f32.vlgmr.msra.gmra.mxu1 %vm1665_vm4, %v2313_v59 }
 0x3e9   : > { %3186 = vmatmul.mubr.msk.f32.vlgmr.msra.gmra.mxu0 %vm1665_vm4, %v2311_v60 }
 0x49e   : > { %v2383_v63 = vpop.f32.mrf.mxu0 }
 0x49f   : > { %v2606_v5 = vsel %vm710_vm0, %v2383_v63, 0.0 }
 0x4a0   : > { %v3177_v1 = vpop.f32.mrf.mxu0 }
 0x4a2   : > { %v2456_v2 = vpop.f32.mrf.mxu1 }
 0x4a3   : > { %v2607_v4 = vsel %vm710_vm0, %v2456_v2, 0.0 }
 0x4a4   : > { %v3182_v3 = vpop.f32.mrf.mxu1  ;;  %v2608_v7 = vadd.f32 %v2607_v4, %v2606_v5 }
 0x4a8   : > { %v2602_v6 = vpop.f32.mrf.mxu1 }
 0x4a9   : > { %v2529_v8 = vpop.f32.mrf.mxu0  ;;  %v2611_v13 = vsel %vm710_vm0, %v2602_v6, 0.0 }
 0x4aa   : > { %v2609_v9 = vsel %vm710_vm0, %v2529_v8, 0.0  ;;  %v3192_v10 = vpop.f32.mrf.mxu1 }
 0x4ab   : > { %v2610_v11 = vadd.f32 %v2609_v9, %v2608_v7  ;;  %v3187_v12 = vpop.f32.mrf.mxu0 }
 0x4ad   : > { %v2612_v14 = vadd.f32 %v2611_v13, %v2610_v11 }
 0x4af   : > { %v2613_v16 = vadd.f32 %v2612_v14, %v3535_v0 }
 0x4b1   : > { %v2620_v17 = vadd.f32 %v2908_v15, %v2613_v16 }
 0x4b3   : > { %2621 = vst.msk [vmem:[%s583_s20] sm:$0xff] %vm710_vm0, %v2620_v17 }
 0x4b4   : > { %3300 = shalt.err (!%p3297_p7)
}
 0x4b5   : > { %s3301_s1 = scalar_lea.hbm %s2636_s27, 128  ;;  %s3305_s14 = scalar_lea.hbm %s3870_s12, 768 }
 0x4b6   : > { %p3302_p9 = scmp.ne.s32.totalorder %s2636_s27, %s3301_s1  ;;  %p3306_p12 = scmp.lt.s32.totalorder %s2636_s27, %s3870_s12 }
 0x4b7   : > { %p3307_p13 = scmp.lt.s32.totalorder %s3305_s14, %s3301_s1 }
 0x4b8   : > { %p3303_p10 = pnand %p3302_p9, %p3500_p3 }
 0x4b9   : > { %p3308_p0 = por %p3307_p13, %p3306_p12 }
 0x4ba   : > { %p3304_p11 = pneg %p3303_p10 }
 0x4bc   : > { %p3309_p1 = pnand %p3308_p0, %p3304_p11 }
 0x4be   : > { %3312 = shalt.err (!%p3309_p1)
}
 0x4bf   : > { %3194 = dma.vmem_to_hbm [thread:$0]  (%p3500_p3), %s2639_s13, 128, %s2636_s27, %s2623_s30  }
 0x4c0 PF: > { %p3200_p2 = scmp.ge.s32.totalorder %s3379_s28, 2  ;;  %s2650_s20 = sand.u32 1, %s3351_s21  }
 0x4c1   : > { %s2651_s18 = scalar_lea.sflag [#allocation3], %s2650_s20 }
 0x4c2   : > { %p3197_p4 = pnand %p3200_p2, %p3509_p8 }
 0x4c4   : > { %p3198_p5 = pneg %p3197_p4 }
 0x4c6   : > { %3346 = dma.done.wait (%p3198_p5), %s2651_s18, 128  }
 0x4c7   : > { %3348 = vsyncadd (%p3198_p5), %s2651_s18, 4294967168  ;;  %s25_s28 = sadd.s32 1, %s3379_s28   ;;  %s3889_s24 = sld [smem:[#allocation5_spill]] }
 0x4c8   : > { %p22_p6 = scmp.ge.s32.totalorder %s25_s28, 8   ;;  %s3890_s25 = sld [smem:[#allocation6_spill]] }
 0x4c9   : > { %s3891_s26 = sld [smem:[#allocation7_spill]]  ;;  %s3893_s21 = smov %s3355_s22 }
 0x4ca   : > { %s3892_s27 = sld [smem:[#allocation8_spill]]  ;;  %s3894_s22 = smov %s3359_s23 }
 0x4cb   : > { %s3895_s23 = smov %s3518_s29  ;;  %24 = sbr.rel (!%p22_p6) target bundleno = 9 (0x9), region = 136 }
 0x4d0   :  { %2656 = vsyncpa [#allocation3], 1 }
 0x4d1   :  { %2658 = vsyncpa [#allocation3 + $0x1], 1 }

</bundles_post_ra>
